<compile_context>
chip_gen: v5e
topology: v5e:2x2
jax: 0.10.0
libtpu: 0.0.40
codegen_flags: <defaults>
</compile_context>

<pallas_src>
from functools import partial

import jax
import jax.numpy as jnp
from jax.experimental import pallas as pl
from jax.experimental.pallas import tpu as pltpu


_VMEM_LIMIT_BYTES = 48 * 1024 * 1024   # < v7x 64 MiB physical, > 32 MiB scoped default
_MAX_ROW_TILE = 1024                   # ~512-1024 rows already at HBM roofline


def ffn_kernel(x_ref, w1_ref, b1_ref, w2_ref, b2_ref, o_ref):
    # ---- LayerNorm (affine already folded into W1/b1): f32 stats, eps=1e-5,
    #      biased variance -> matches PyTorch nn.LayerNorm ----
    x = x_ref[...].astype(jnp.float32)
    mean = jnp.mean(x, axis=-1, keepdims=True)
    xc = x - mean
    var = jnp.mean(xc * xc, axis=-1, keepdims=True)
    xn = xc * jax.lax.rsqrt(var + 1e-5)

    # ---- dense1.linear (LN affine folded in) + ReLU (dropout p=0 is identity) ----
    wdt = w1_ref.dtype
    h = jnp.dot(xn.astype(wdt), w1_ref[...],
                preferred_element_type=jnp.float32) + b1_ref[...]
    h = jnp.maximum(h, 0.0)

    # ---- dense2.linear (no norm, no activation) ----
    y = jnp.dot(h.astype(wdt), w2_ref[...],
                preferred_element_type=jnp.float32) + b2_ref[...]

    o_ref[...] = y.astype(o_ref.dtype)


def _round_up(x, m):
    return (x + m - 1) // m * m


def _choose_row_tile(M, L, H, weight_bytes, act_itemsize, out_itemsize):
    """Row tile: multiple of 8, <= 1024 rows, sized so that the pipelined I/O
    buffers PLUS the kernel-body intermediates fit the VMEM limit, and kept at
    >= 4 grid steps when M allows (>= 2 per v7x TensorCore) so the input DMA /
    output writeback stay overlapped with compute."""
    budget = max(_VMEM_LIMIT_BYTES - 2 * weight_bytes - (8 << 20), 1 << 20)
    # Per-row bytes: double-buffered x tile + double-buffered output tile ...
    io_bytes = 2 * act_itemsize * L + 2 * out_itemsize * L
    # ... plus body intermediates: x/xc/xn f32 (we count 2 live (tm,L) f32),
    # xn bf16, h f32, h bf16, y f32.
    body_bytes = 2 * 4 * L + 2 * L + 4 * H + 2 * H + 4 * L
    bytes_per_row = io_bytes + body_bytes
    cap = min(_MAX_ROW_TILE, budget // bytes_per_row)
    cap = max(8, (cap // 8) * 8)
    four_steps = _round_up(max(pl.cdiv(M, 4), 8), 8)
    return max(8, min(cap, four_steps))


@partial(jax.jit, static_argnames=("weight_dtype", "act_dtype", "out_dtype", "tm"))
def feed_forward_block(x_ncl, gamma, beta, w1, b1, w2, b2, *,
                       weight_dtype=jnp.bfloat16, act_dtype=jnp.bfloat16,
                       out_dtype=None, tm=None):
    """x_ncl: (N, C, L).  Returns relu(LN(x) @ W1 + b1) @ W2 + b2, shape (N, C, L).
    W1:(L,2L), W2:(2L,L) are already transposed vs. nn.Linear storage."""
    N, C, L = x_ncl.shape
    H = w1.shape[1]                      # = 2 * L
    M = N * C
    if out_dtype is None:
        out_dtype = x_ncl.dtype

    # Fold the LayerNorm affine into the first linear (tiny, fuses under jit).
    w1f = (gamma[:, None].astype(jnp.float32)
           * w1.astype(jnp.float32)).astype(weight_dtype)
    b1f = (beta.astype(jnp.float32) @ w1.astype(jnp.float32)
           + b1.astype(jnp.float32)).reshape(1, H)
    w2c = w2.astype(weight_dtype)
    b2c = b2.astype(jnp.float32).reshape(1, L)

    weight_bytes = (L * H + H * L) * jnp.dtype(weight_dtype).itemsize
    if tm is None:
        tm = _choose_row_tile(M, L, H, weight_bytes,
                              jnp.dtype(act_dtype).itemsize,
                              jnp.dtype(out_dtype).itemsize)

    # bf16 activations in; no padding -- the last grid step may be a partial
    # block whose tail rows compute on garbage, but rows are independent and
    # the out-of-bounds writes are discarded, so nothing invalid is read back.
    x2d = x_ncl.reshape(M, L).astype(act_dtype)

    out2d = pl.pallas_call(
        ffn_kernel,
        out_shape=jax.ShapeDtypeStruct((M, L), out_dtype),
        grid_spec=pltpu.PrefetchScalarGridSpec(
            num_scalar_prefetch=0,
            grid=(pl.cdiv(M, tm),),
            in_specs=[
                pl.BlockSpec((tm, L), lambda i: (i, 0)),   # x row tile (bf16)
                pl.BlockSpec((L, H), lambda i: (0, 0)),    # W1' (LN-folded), bf16
                pl.BlockSpec((1, H), lambda i: (0, 0)),    # b1' (f32)
                pl.BlockSpec((H, L), lambda i: (0, 0)),    # W2, bf16
                pl.BlockSpec((1, L), lambda i: (0, 0)),    # b2 (f32)
            ],
            out_specs=pl.BlockSpec((tm, L), lambda i: (i, 0)),
        ),
        compiler_params=pltpu.CompilerParams(
            dimension_semantics=("parallel",),
            vmem_limit_bytes=_VMEM_LIMIT_BYTES,
        ),
    )(x2d, w1f, b1f, w2c, b2c)

    return out2d.reshape(N, C, L)


def reference_ffn(x_ncl, gamma, beta, w1, b1, w2, b2,
                  weight_dtype=jnp.bfloat16, act_dtype=jnp.bfloat16):
    """Plain-JAX reference following the same numerical path as the kernel
    (bf16 activations/weights, f32 LayerNorm statistics, f32 accumulation,
    LN affine folded into W1/b1)."""
    x = x_ncl.astype(act_dtype).astype(jnp.float32)
    mean = jnp.mean(x, axis=-1, keepdims=True)
    xc = x - mean
    var = jnp.mean(xc * xc, axis=-1, keepdims=True)
    xn = xc * jax.lax.rsqrt(var + 1e-5)
    w1f = (gamma[:, None] * w1).astype(weight_dtype)
    b1f = beta @ w1 + b1
    h = jnp.maximum(
        jnp.dot(xn.astype(weight_dtype), w1f,
                preferred_element_type=jnp.float32) + b1f, 0.0)
    y = jnp.dot(h.astype(weight_dtype), w2.astype(weight_dtype),
                preferred_element_type=jnp.float32) + b2
    return y.astype(x_ncl.dtype)


if __name__ == "__main__":
    # Small shapes consistent with the module: the FFN inside GRUBlock sees
    # (batch, positions, channels=convfilters) -> L = 32 channels here.
    N, C, L = 2, 8, 32
    H = 2 * L

    key = jax.random.PRNGKey(0)
    kx, kw1, kb1, kw2, kb2 = jax.random.split(key, 5)

    x = jax.random.normal(kx, (N, C, L), dtype=jnp.float32)

    # LayerNorm: gamma=1, beta=0; linears ~ fan-in scaled.
    gamma = jnp.ones((L,), dtype=jnp.float32)
    beta = jnp.zeros((L,), dtype=jnp.float32)
    w1 = jax.random.normal(kw1, (L, H), dtype=jnp.float32) * (1.0 / jnp.sqrt(L))
    b1 = jax.random.normal(kb1, (H,), dtype=jnp.float32) * 0.01
    w2 = jax.random.normal(kw2, (H, L), dtype=jnp.float32) * (1.0 / jnp.sqrt(H))
    b2 = jax.random.normal(kb2, (L,), dtype=jnp.float32) * 0.01

    out = feed_forward_block(x, gamma, beta, w1, b1, w2, b2)
    out = jax.block_until_ready(out)

    ref = reference_ffn(x, gamma, beta, w1, b1, w2, b2)
    assert out.shape == (N, C, L)
    assert jnp.allclose(out, ref, atol=2e-2, rtol=2e-2), "mismatch vs reference"

    print("KERNEL_OK")
</pallas_src>

<mosaic_0001>
module attributes {stable_mosaic.version = 11 : i64} {
  func.func @ffn_kernel(%arg0: i32, %arg1: memref<8x32xbf16, #tpu.memory_space<vmem>>, %arg2: memref<32x64xbf16, #tpu.memory_space<vmem>>, %arg3: memref<1x64xf32, #tpu.memory_space<vmem>>, %arg4: memref<64x32xbf16, #tpu.memory_space<vmem>>, %arg5: memref<1x32xf32, #tpu.memory_space<vmem>>, %arg6: memref<8x32xf32, #tpu.memory_space<vmem>>) attributes {dimension_semantics = [#tpu.dimension_semantics<parallel>], iteration_bounds = array<i64: 2>, scalar_prefetch = 0 : i64, scratch_operands = 0 : i64, tpu.core_type = #tpu.core_type<tc>, window_params = [{transform_indices = @transform_0, window_bounds = array<i64: 8, 32>}, {pipeline_mode = #tpu.pipeline_mode<synchronous>, transform_indices = @transform_1, window_bounds = array<i64: 32, 64>}, {pipeline_mode = #tpu.pipeline_mode<synchronous>, transform_indices = @transform_2, window_bounds = array<i64: 1, 64>}, {pipeline_mode = #tpu.pipeline_mode<synchronous>, transform_indices = @transform_3, window_bounds = array<i64: 64, 32>}, {pipeline_mode = #tpu.pipeline_mode<synchronous>, transform_indices = @transform_4, window_bounds = array<i64: 1, 32>}, {transform_indices = @transform_5, window_bounds = array<i64: 8, 32>}]} {
    %c0 = arith.constant 0 : index
    %c0_0 = arith.constant 0 : index
    %0 = vector.load %arg1[%c0, %c0_0] : memref<8x32xbf16, #tpu.memory_space<vmem>>, vector<8x32xbf16>
    %1 = arith.extf %0 : vector<8x32xbf16> to vector<8x32xf32>
    %cst = arith.constant dense<0.000000e+00> : vector<8xf32>
    %2 = vector.multi_reduction <add>, %1, %cst [1] : vector<8x32xf32> to vector<8xf32>
    %3 = vector.shape_cast %2 : vector<8xf32> to vector<8x1xf32>
    %cst_1 = arith.constant 3.200000e+01 : f32
    %4 = vector.broadcast %cst_1 : f32 to vector<8x1xf32>
    %5 = arith.divf %3, %4 : vector<8x1xf32>
    %6 = vector.broadcast %5 : vector<8x1xf32> to vector<8x32xf32>
    %7 = arith.subf %1, %6 : vector<8x32xf32>
    %8 = arith.mulf %7, %7 : vector<8x32xf32>
    %cst_2 = arith.constant dense<0.000000e+00> : vector<8xf32>
    %9 = vector.multi_reduction <add>, %8, %cst_2 [1] : vector<8x32xf32> to vector<8xf32>
    %10 = vector.shape_cast %9 : vector<8xf32> to vector<8x1xf32>
    %cst_3 = arith.constant 3.200000e+01 : f32
    %11 = vector.broadcast %cst_3 : f32 to vector<8x1xf32>
    %12 = arith.divf %10, %11 : vector<8x1xf32>
    %cst_4 = arith.constant 9.99999974E-6 : f32
    %13 = vector.broadcast %cst_4 : f32 to vector<8x1xf32>
    %14 = arith.addf %12, %13 : vector<8x1xf32>
    %15 = math.rsqrt %14 : vector<8x1xf32>
    %16 = vector.broadcast %15 : vector<8x1xf32> to vector<8x32xf32>
    %17 = arith.mulf %7, %16 : vector<8x32xf32>
    %18 = arith.truncf %17 : vector<8x32xf32> to vector<8x32xbf16>
    %c0_5 = arith.constant 0 : index
    %c0_6 = arith.constant 0 : index
    %19 = vector.load %arg2[%c0_5, %c0_6] : memref<32x64xbf16, #tpu.memory_space<vmem>>, vector<32x64xbf16>
    %cst_7 = arith.constant dense<0.000000e+00> : vector<8x64xf32>
    %20 = tpu.matmul %18, %19, %cst_7 {dimension_numbers = #tpu.dot_dimension_numbers<[1], [0], [0], [1], [0, 0, 1, 1], [], []>} : vector<8x32xbf16>, vector<32x64xbf16>, vector<8x64xf32> -> vector<8x64xf32>
    %c0_8 = arith.constant 0 : index
    %c0_9 = arith.constant 0 : index
    %21 = vector.load %arg3[%c0_8, %c0_9] : memref<1x64xf32, #tpu.memory_space<vmem>>, vector<1x64xf32>
    %22 = vector.broadcast %21 : vector<1x64xf32> to vector<8x64xf32>
    %23 = arith.addf %20, %22 : vector<8x64xf32>
    %cst_10 = arith.constant 0.000000e+00 : f32
    %24 = vector.broadcast %cst_10 : f32 to vector<8x64xf32>
    %25 = arith.maximumf %23, %24 : vector<8x64xf32>
    %26 = arith.truncf %25 : vector<8x64xf32> to vector<8x64xbf16>
    %c0_11 = arith.constant 0 : index
    %c0_12 = arith.constant 0 : index
    %27 = vector.load %arg4[%c0_11, %c0_12] : memref<64x32xbf16, #tpu.memory_space<vmem>>, vector<64x32xbf16>
    %cst_13 = arith.constant dense<0.000000e+00> : vector<8x32xf32>
    %28 = tpu.matmul %26, %27, %cst_13 {dimension_numbers = #tpu.dot_dimension_numbers<[1], [0], [0], [1], [0, 0, 1, 1], [], []>} : vector<8x64xbf16>, vector<64x32xbf16>, vector<8x32xf32> -> vector<8x32xf32>
    %c0_14 = arith.constant 0 : index
    %c0_15 = arith.constant 0 : index
    %29 = vector.load %arg5[%c0_14, %c0_15] : memref<1x32xf32, #tpu.memory_space<vmem>>, vector<1x32xf32>
    %30 = vector.broadcast %29 : vector<1x32xf32> to vector<8x32xf32>
    %31 = arith.addf %28, %30 : vector<8x32xf32>
    %c0_16 = arith.constant 0 : index
    %c0_17 = arith.constant 0 : index
    %32 = vector.load %arg6[%c0_16, %c0_17] : memref<8x32xf32, #tpu.memory_space<vmem>>, vector<8x32xf32>
    tpu.vector_store %arg6[%c0_16, %c0_17], %31 {strides = array<i32>} : memref<8x32xf32, #tpu.memory_space<vmem>>, vector<8x32xf32>,
    return
  }
  func.func @transform_0(%arg0: i32) -> (i32, i32) {
    %c0_i32 = arith.constant 0 : i32
    %c0_i32_0 = arith.constant 0 : i32
    return %arg0, %c0_i32 : i32, i32
  }
  func.func @transform_1(%arg0: i32) -> (i32, i32) {
    %c0_i32 = arith.constant 0 : i32
    %c0_i32_0 = arith.constant 0 : i32
    %c0_i32_1 = arith.constant 0 : i32
    return %c0_i32, %c0_i32_0 : i32, i32
  }
  func.func @transform_2(%arg0: i32) -> (i32, i32) {
    %c0_i32 = arith.constant 0 : i32
    %c0_i32_0 = arith.constant 0 : i32
    %c0_i32_1 = arith.constant 0 : i32
    return %c0_i32, %c0_i32_0 : i32, i32
  }
  func.func @transform_3(%arg0: i32) -> (i32, i32) {
    %c0_i32 = arith.constant 0 : i32
    %c0_i32_0 = arith.constant 0 : i32
    %c0_i32_1 = arith.constant 0 : i32
    return %c0_i32, %c0_i32_0 : i32, i32
  }
  func.func @transform_4(%arg0: i32) -> (i32, i32) {
    %c0_i32 = arith.constant 0 : i32
    %c0_i32_0 = arith.constant 0 : i32
    %c0_i32_1 = arith.constant 0 : i32
    return %c0_i32, %c0_i32_0 : i32, i32
  }
  func.func @transform_5(%arg0: i32) -> (i32, i32) {
    %c0_i32 = arith.constant 0 : i32
    %c0_i32_0 = arith.constant 0 : i32
    return %arg0, %c0_i32 : i32, i32
  }
}

</mosaic_0001>

<bundles_post_ra>
// kernel: feed_forward_block.1
= control target key start
LH: loop header
LB: loop body
LE: loop exit
PB: predicated region body
PF: predicated region fallthrough
CT: control target
= control target key end

     0   :  { %10 = vsyncpa [#allocation3], 0  ;;  %s717_s0 = inlined_call_operand.vmem [shape: bf16[16,32], index: 0, kind: input, shape index: {}]   ;;  %s718_s1 = inlined_call_operand.vmem [shape: bf16[32,64], index: 1, kind: input, shape index: {}]   ;;  %s719_s2 = inlined_call_operand.vmem [shape: f32[1,64], index: 2, kind: input, shape index: {}]   ;;  %s720_s3 = inlined_call_operand.vmem [shape: bf16[64,32], index: 3, kind: input, shape index: {}]   ;;  %s721_s4 = inlined_call_operand.vmem [shape: f32[1,32], index: 4, kind: input, shape index: {}]   ;;  %s722_s5 = inlined_call_operand.hbm [shape: f32[16,32], index: 5, kind: output, shape index: {}]  }
   0x1   :  { %12 = vsyncpa [#allocation3 + $0x1], 0  ;;  %s604_s18 = smov 0   ;;  %s606_s19 = smov 0  }
   0x2   :  { %s608_s20 = smov 0   ;;  %s610_s21 = smov 0  }
   0x3 LB: > { %s625_s22 = sadd.s32 4294967295, %s571_s21   ;;  %s421_s23 = sadd.s32 4294967294, %s571_s21   ;;  %s571_s21 = sphi %s610_s21, %s728_s21   ;;  %s567_s20 = sphi %s608_s20, %s727_s20   ;;  %s563_s19 = sphi %s606_s19, %s726_s19   ;;  %s559_s18 = sphi %s604_s18, %s725_s18  }
   0x4   : > { %s629_s24 = sadd.s32 1, %s571_s21   ;;  %s135_s25 = sadd.s32 1, %s567_s20 }
   0x5   : > { %s132_s26 = ssub.s32 %s571_s21, %s629_s24  ;;  %p145_p0 = scmp.ne.s32.totalorder %s567_s20, %s563_s19 }
   0x6   : > { %p133_p1 = scmp.eq.s32.totalorder %s132_s26, 0  ;;  %p146_p2 = scmp.eq.s32.totalorder %s625_s22, 1 }
   0x7   : > { %p151_p3 = scmp.ne.s32.totalorder %s563_s19, %s559_s18  ;;  %p152_p4 = scmp.eq.s32.totalorder %s421_s23, 1 }
   0x8   : > { %s640_s27 = scalar_select %p133_p1, %s567_s20, %s135_s25  }
   0x9   : > { %p642_p5 = por %p146_p2, %p145_p0  ;;  %p646_p6 = por %p152_p4, %p151_p3 }
   0xa   : > { %p424_p7 = scmp.ge.s32.totalorder %s571_s21, 1  ;;  %p189_p8 = scmp.lt.s32.totalorder %s571_s21, 3 }
   0xc   : > { %p190_p9 = pnand %p424_p7, %p189_p8 }
   0xd   : > { %p216_p10 = scmp.lt.s32.totalorder (!%p190_p9), %s625_s22, 1  ;;  %s213_s8 = sand.u32 (!%p190_p9), 1, %s563_s19  }
   0xe   : > { %193 = sbr.rel (%p190_p9) target bundleno = 558 (0x22e), region = 40  ;;  %s425_s10 = sshll.u32 (!%p190_p9), %s213_s8, 3 }
   0xf   : > { %s215_s16 = scalar_lea.vmem (!%p190_p9), [#allocation2], %s425_s10  ;;  %s529_s7 = scalar_lea.hbm (!%p190_p9), %s722_s5, 16 }
  0x10   : > { %s359_s17 = sshll.u32 (!%p190_p9), %s215_s16, 4  ;;  %s360_s17 = int_to_ptr.vmem [resolvable:$true] %s359_s17 }
  0x13   : > { %s217_s30 = scalar_select %p216_p10, %s625_s22, 1  ;;  %vm223_vm0 = vcmask 261120   ;;  %v573_v3 = vmov 32.0   ;;  %v458_v15 = vld [vmem:[%s718_s1 + $0x8] sm:$0xff]  ;;  %v457_v16 = vld [vmem:[%s718_s1] sm:$0xff]  ;;  %v462_v17 = vld [vmem:[%s720_s3 + $0x18] sm:$0xff] }
  0x14   : > { %505 = vrcp.f32 %v573_v3  ;;  %283 = vmatpush.bf16.msra.mxu0 %v458_v15  ;;  %336 = vmatpush.bf16.msra.mxu1 %v462_v17  ;;  %v461_v18 = vld [vmem:[%s720_s3 + $0x10] sm:$0xff]  ;;  %v460_v31 = vld [vmem:[%s720_s3 + $0x8] sm:$0xff]  ;;  %v459_v32 = vld [vmem:[%s720_s3] sm:$0xff]  ;;  %vm328_vm5 = vcmask 523264  }
  0x15   : > { %s426_s6 = sshll.u32 %s217_s30, 2  ;;  %v503_v33 = vld [vmem:[%s719_s2] ss:$0 sm:$0xff] }
  0x16   : > { %s219_s9 = scalar_lea.vmem %s717_s0, %s426_s6  ;;  %v504_v39 = vld [vmem:[%s721_s4] ss:$0 sm:$0xff] }
  0x17   : > { %v221_v0 = vld [vmem:[%s219_s9] sm:$0xf]  ;;  %s454_s9 = sshll.u32 %s625_s22, 3  ;;  %s347_s22 = scalar_lea.sflag [#allocation3], %s213_s8 }
  0x18   : > { %v222_v1 = vunpack.c.l.bf16 %v221_v0  ;;  %284 = vmatpush.bf16.msra.mxu0 %v457_v16  ;;  %337 = vmatpush.bf16.msra.mxu1 %v461_v18  ;;  %s357_s13 = scalar_lea.hbm %s722_s5, %s454_s9 }
  0x19   : > { %s361_s23 = sshll.u32 %s357_s13, 4  ;;  %s362_s23 = int_to_ptr.hbm [resolvable:$true] %s361_s23 }
  0x1a   : > { %v224_v2 = vsel %vm223_vm0, %v222_v1, 0.0  ;;  %v506_v4 = vpop.eup %505  ;;  %s523_s25 = sshra.s32 %s362_s23, 4  ;;  %s524_s25 = int_to_ptr.hbm [resolvable:$true] %s523_s25 }
  0x1b   : > { %225 = vadd.xlane.f32.xlu0 %v224_v2  ;;  %v228_v5 = vmul.f32 32.0, %v506_v4  ;;  %vm232_vm1 = vweird.f32 %v506_v4  ;;  %s525_s26 = scalar_lea.hbm %s524_s25, 8  ;;  %p530_p0 = scmp.lt.s32.totalorder %s524_s25, %s722_s5 }
  0x1c   : > { %338 = vmatpush.bf16.msra.mxu1 %v460_v31  ;;  %p526_p11 = scmp.ne.s32.totalorder %s524_s25, %s525_s26  ;;  %p531_p1 = scmp.lt.s32.totalorder %s529_s7, %s525_s26 }
  0x1d   : > { %v229_v6 = vsub.f32 1.0, %v228_v5 }
  0x1e   : > { %p527_p12 = pnand %p526_p11, %p642_p5  ;;  %p532_p2 = por %p531_p1, %p530_p0 }
  0x1f   : > { %v230_v7 = vmul.f32 %v506_v4, %v229_v6 }
  0x20   : > { %339 = vmatpush.bf16.msra.mxu1 %v459_v32  ;;  %p528_p13 = pneg %p527_p12 }
  0x21   : > { %v231_v8 = vadd.f32 %v506_v4, %v230_v7 }
  0x22   : > { %p533_p3 = pnand %p532_p2, %p528_p13 }
  0x23   : > { %v233_v9 = vsel %vm232_vm1, %v506_v4, %v231_v8 }
  0x8e   : > { %v226_v10 = vpop.xlane.xlu0 %225 }
  0x8f   : > { %v234_v11 = vmul.f32 %v233_v9, %v226_v10 }
  0x91   : > { %v235_v12 = vsub.f32 %v222_v1, %v234_v11 }
  0x93   : > { %v236_v13 = vmul.f32 %v235_v12, %v235_v12 }
  0x95   : > { %v237_v14 = vsel %vm223_vm0, %v236_v13, 0.0 }
  0x96   : > { %238 = vadd.xlane.f32.xlu0 %v237_v14 }
 0x109   : > { %v239_v19 = vpop.xlane.xlu0 %238 }
 0x10a   : > { %v240_v20 = vmul.f32 %v239_v19, %v233_v9 }
 0x10c   : > { %v241_v21 = vadd.f32 1e-05, %v240_v20 }
 0x10e   : > { %507 = vrsqrt.f32 %v241_v21  ;;  %vm248_vm3 = vweird.f32 %v241_v21 }
 0x114   : > { %v508_v22 = vpop.eup %507 }
 0x115   : > { %v243_v23 = vmul.f32 %v508_v22, %v241_v21  ;;  %vm249_vm2 = vweird.f32 %v508_v22 }
 0x116   : > { %vm250_vm4 = vmor %vm248_vm3, %vm249_vm2 }
 0x117   : > { %v244_v24 = vmul.f32 %v508_v22, %v243_v23 }
 0x119   : > { %v245_v25 = vmul.f32 0.5, %v244_v24 }
 0x11b   : > { %v246_v26 = vsub.f32 1.5, %v245_v25 }
 0x11d   : > { %v247_v27 = vmul.f32 %v508_v22, %v246_v26 }
 0x11f   : > { %v251_v28 = vsel %vm250_vm4, %v508_v22, %v247_v27 }
 0x120   : > { %v252_v29 = vmul.f32 %v251_v28, %v235_v12 }
 0x122   : > { %v253_v30 = vpack.c.bf16 %v252_v29, %v252_v29 }
 0x124   : > { %435 = vmatmul.msk.bf16.vlgmr.msra.gmra.mxu0 %vm223_vm0, %v253_v30 }
 0x1a1   : > { %v286_v34 = vpop.f32.mrf.mxu0 }
 0x1a2   : > { %v287_v35 = vadd.f32 %v503_v33, %v286_v34 }
 0x1a4   : > { %v290_v36 = vmax.f32 %v287_v35, 0.0 }
 0x1a6   : > { %v291_v37 = vpack.c.bf16 %v290_v36, %v290_v36 }
 0x1a8   : > { %452 = vmatmul.msk.bf16.vlgmr.msra.gmra.mxu1 %vm328_vm5, %v291_v37 }
 0x1a9   : > { %v288_v38 = vpop.f32.mrf.mxu0 }
 0x225   : > { %v341_v40 = vpop.f32.mrf.mxu1 }
 0x226   : > { %v342_v41 = vadd.f32 %v504_v39, %v341_v40 }
 0x228   : > { %345 = vst.msk [vmem:[%s215_s16] sm:$0xff] %vm223_vm0, %v342_v41 }
 0x229   : > { %536 = shalt.err (!%p533_p3)
}
 0x22a   : > { %463 = dma.vmem_to_hbm [thread:$0]  (%p642_p5), %s360_s17, 128, %s362_s23, %s347_s22  }
 0x22d   : > { %v343_v42 = vpop.f32.mrf.mxu1 }
 0x22e PF: > { %p469_p4 = scmp.ge.s32.totalorder %s571_s21, 2  ;;  %s373_s8 = sand.u32 1, %s559_s18  }
 0x22f   : > { %s374_s11 = scalar_lea.sflag [#allocation3], %s373_s8 }
 0x230   : > { %p466_p7 = pnand %p469_p4, %p646_p6 }
 0x232   : > { %p467_p8 = pneg %p466_p7 }
 0x234   : > { %554 = dma.done.wait (%p467_p8), %s374_s11, 128  }
 0x235   : > { %556 = vsyncadd (%p467_p8), %s374_s11, 4294967168  ;;  %p15_p9 = scmp.ge.s32.totalorder %s629_s24, 4   ;;  %s725_s18 = smov %s563_s19 }
 0x236   : > { %s726_s19 = smov %s567_s20  ;;  %s727_s20 = smov %s640_s27 }
 0x237   : > { %s728_s21 = smov %s629_s24  ;;  %17 = sbr.rel (!%p15_p9) target bundleno = 3 (0x3), region = 75 }
 0x23c   :  { %380 = vsyncpa [#allocation3], 1 }
 0x23d   :  { %382 = vsyncpa [#allocation3 + $0x1], 1 }

</bundles_post_ra>
